<compile_context>
chip_gen: v6e
topology: v6e:2x2x1
jax: 0.10.0
libtpu: 0.0.40
codegen_flags: <defaults>
</compile_context>

<pallas_src>
import functools
from typing import Dict, Optional

import jax
import jax.numpy as jnp
from jax.experimental import pallas as pl
from jax.experimental.pallas import tpu as pltpu

_LANES = 128
_MAX_TILE_M = 2048  # (2048, 128) f32 tile = 1 MiB per stream per buffer


def _round_up(v: int, m: int) -> int:
    return (v + m - 1) // m * m


def _sublane_granule(dtype) -> int:
    # Minimum sublane tile per dtype: f32 -> 8, bf16 -> 16, int8/fp8 -> 32.
    itemsize = jnp.dtype(dtype).itemsize
    return max(8, 32 // max(itemsize, 1))


def _loss_kernel(x_ref, t_ref, out_ref, acc_bce, acc_int, acc_den, *,
                 tile_m, n_valid, ignore_index, need_mask):
    c = pl.program_id(0)          # parallel (core) axis
    j = pl.program_id(1)          # arbitrary (reduction) axis
    steps = pl.num_programs(1)

    @pl.when(j == 0)
    def _init():
        acc_bce[...] = jnp.zeros_like(acc_bce)
        acc_int[...] = jnp.zeros_like(acc_int)
        acc_den[...] = jnp.zeros_like(acc_den)

    x = x_ref[...].astype(jnp.float32)
    t = t_ref[...].astype(jnp.float32)

    # One shared transcendental for both BCE and sigmoid:
    #   e = exp(-|x|)
    #   sigmoid(x) = where(x >= 0, 1, e) / (1 + e)     (approx recip + Newton)
    #   bce        = max(x, 0) - x*t + log1p(e)        (numerically stable)
    e = jnp.exp(-jnp.abs(x))
    d = 1.0 + e
    r = pl.reciprocal(d, approx=True)
    r = r * (2.0 - d * r)                    # one Newton refinement step
    p = jnp.where(x >= 0.0, 1.0, e) * r      # sigmoid(x)
    bce = jnp.maximum(x, 0.0) - x * t + jnp.log1p(e)

    keep = (t != float(ignore_index)) if ignore_index is not None else None

    def _accumulate(bce_v, inter_v, den_v):
        # Sublane-aligned fold of the (tile_m, 128) tile into (8, 128):
        # pure vreg-to-vreg VALU adds, no cross-lane movement.
        acc_bce[...] += jnp.sum(bce_v.reshape(tile_m // 8, 8, _LANES), axis=0)
        acc_int[...] += jnp.sum(inter_v.reshape(tile_m // 8, 8, _LANES), axis=0)
        acc_den[...] += jnp.sum(den_v.reshape(tile_m // 8, 8, _LANES), axis=0)

    def _fast_path():
        inter = p * t
        den = p + t
        if keep is not None:
            inter = jnp.where(keep, inter, 0.0)
            den = jnp.where(keep, den, 0.0)
        _accumulate(bce, inter, den)

    if not need_mask:
        _fast_path()
    else:
        gi = c * steps + j                       # global block index
        block_elems = tile_m * _LANES
        fully_valid = (gi + 1) * block_elems <= n_valid

        pl.when(fully_valid)(_fast_path)

        @pl.when(jnp.logical_not(fully_valid))
        def _masked_path():
            # Only blocks containing padding / ragged tail / phantom coverage
            # pay for the iota + selects.
            row_i = jax.lax.broadcasted_iota(jnp.int32, (tile_m, _LANES), 0)
            col_i = jax.lax.broadcasted_iota(jnp.int32, (tile_m, _LANES), 1)
            g = gi * block_elems + row_i * _LANES + col_i
            valid = g < n_valid
            bce_m = jnp.where(valid, bce, 0.0)
            dice_m = valid if keep is None else jnp.logical_and(valid, keep)
            inter = jnp.where(dice_m, p * t, 0.0)
            den = jnp.where(dice_m, p + t, 0.0)
            _accumulate(bce_m, inter, den)

    @pl.when(j == steps - 1)
    def _finalize():
        s_bce = jnp.sum(acc_bce[...])
        s_int = jnp.sum(acc_int[...])
        s_den = jnp.sum(acc_den[...])
        lane = jax.lax.broadcasted_iota(jnp.int32, (1, _LANES), 1)
        out_ref[...] = jnp.where(lane == 0, s_bce,
                       jnp.where(lane == 1, s_int,
                       jnp.where(lane == 2, s_den, 0.0)))


def _binary_ce_dice_single(x: jax.Array, targets: jax.Array,
                           ignore_index: Optional[int], smooth: float,
                           eps: float) -> jax.Array:
    assert x.shape == targets.shape, (x.shape, targets.shape)
    total = int(x.size)
    assert total > 0

    flat_x = x.reshape(-1)
    flat_t = targets.reshape(-1)

    # dtype-aware pad granule (8/16/32 sublanes x 128 lanes); pad only up to
    # one minimal tile, so aligned inputs take no pad copy at all.
    granule = max(_sublane_granule(x.dtype),
                  _sublane_granule(targets.dtype)) * _LANES
    padded = _round_up(total, granule)
    pad = padded - total
    if pad:
        flat_x = jnp.pad(flat_x, (0, pad))
        flat_t = jnp.pad(flat_t, (0, pad))

    rows = padded // _LANES                  # multiple of the sublane granule
    tile_m = min(_MAX_TILE_M, rows)          # multiple of the granule too
    total_blocks = (rows + tile_m - 1) // tile_m
    num_cores = 2 if total_blocks >= 2 else 1
    steps = (total_blocks + num_cores - 1) // num_cores
    coverage = num_cores * steps * tile_m * _LANES
    need_mask = coverage != total

    x2 = flat_x.reshape(rows, _LANES)
    t2 = flat_t.reshape(rows, _LANES)

    if num_cores * steps == total_blocks:
        def in_index(c, j):
            return (c * steps + j, 0)
    else:
        # Odd block count: the last (phantom) block of the last core re-reads
        # the final real block; its contribution is fully masked in-kernel.
        def in_index(c, j):
            return (jnp.minimum(c * steps + j, total_blocks - 1), 0)

    kernel = functools.partial(
        _loss_kernel, tile_m=tile_m, n_valid=total,
        ignore_index=ignore_index, need_mask=need_mask)

    tile_spec = pl.BlockSpec((tile_m, _LANES), in_index)
    out_spec = pl.BlockSpec((1, _LANES), lambda c, j: (c, 0))

    partial_sums = pl.pallas_call(
        kernel,
        out_shape=jax.ShapeDtypeStruct((num_cores, _LANES), jnp.float32),
        grid_spec=pltpu.PrefetchScalarGridSpec(
            num_scalar_prefetch=0,
            grid=(num_cores, steps),
            in_specs=[tile_spec, tile_spec],
            out_specs=out_spec,
            scratch_shapes=[pltpu.VMEM((8, _LANES), jnp.float32)] * 3,
        ),
        compiler_params=pltpu.CompilerParams(
            dimension_semantics=("parallel", "arbitrary")),
    )(x2, t2)

    # Tiny wrapper-side combine of the per-core partial sums.
    sums = jnp.sum(partial_sums, axis=0)
    s_bce, s_int, s_den = sums[0], sums[1], sums[2]
    ce = s_bce / jnp.float32(total)
    dice = (2.0 * s_int + float(smooth)) / (s_den + float(smooth) + float(eps))
    return ce + (1.0 - dice)


def binary_ce_with_dice_loss_forward(outputs: Dict[str, jax.Array],
                                     targets: jax.Array,
                                     ignore_index: Optional[int] = None,
                                     smooth: float = 0.0,
                                     eps: float = 1e-7) -> jax.Array:
    # The reference module computes a loss per dict entry but only ever
    # returns losses['out']; the discarded auxiliary heads are skipped here.
    return _binary_ce_dice_single(outputs["out"], targets, ignore_index,
                                  smooth, eps)


def _reference(x, t, ignore_index=None, smooth=0.0, eps=1e-7):
    x = x.astype(jnp.float32)
    t = t.astype(jnp.float32)
    bce = jnp.maximum(x, 0.0) - x * t + jnp.log1p(jnp.exp(-jnp.abs(x)))
    ce = jnp.mean(bce)
    p = jax.nn.sigmoid(x)
    if ignore_index is not None:
        m = (t != float(ignore_index)).astype(jnp.float32)
    else:
        m = jnp.ones_like(t)
    inter = jnp.sum(p * t * m)
    den = jnp.sum(p * m) + jnp.sum(t * m)
    dice = (2.0 * inter + smooth) / (den + smooth + eps)
    return ce + (1.0 - dice)


def _close(a, b, rel=1e-3, atol=1e-3):
    return abs(float(a) - float(b)) <= atol + rel * abs(float(b))


if __name__ == "__main__":
    key = jax.random.PRNGKey(0)
    k1, k2, k3, k4, k5, k6 = jax.random.split(key, 6)

    # Test 1: small NCHW logits, binary targets, no ignore_index (single block).
    x = jax.random.normal(k1, (2, 4, 16, 16), dtype=jnp.float32)
    targets = (jax.random.uniform(k2, (2, 4, 16, 16)) > 0.5).astype(jnp.float32)
    outputs = {"out": x, "aux": x * 0.5}   # aux head is skipped (discarded anyway)
    loss = jax.block_until_ready(
        binary_ce_with_dice_loss_forward(outputs, targets))
    ref = jax.block_until_ready(_reference(x, targets))
    assert _close(loss, ref), (float(loss), float(ref))

    # Test 2: ragged shape (padding + masked path) with ignore_index and smooth.
    x2 = jax.random.normal(k3, (2, 3, 15, 17), dtype=jnp.float32)
    u = jax.random.uniform(k4, (2, 3, 15, 17))
    t2 = jnp.where(u < 0.45, 0.0, jnp.where(u < 0.9, 1.0, 2.0)).astype(jnp.float32)
    loss2 = jax.block_until_ready(
        binary_ce_with_dice_loss_forward({"out": x2}, t2,
                                         ignore_index=2, smooth=1.0))
    ref2 = jax.block_until_ready(_reference(x2, t2, ignore_index=2, smooth=1.0))
    assert _close(loss2, ref2), (float(loss2), float(ref2))

    # Test 3: multi-block input exercising the 2-core grid split + fast/masked
    # path gating (core 0 fully valid, core 1 ragged last block).
    x3 = jax.random.normal(k5, (8, 4, 96, 96), dtype=jnp.float32)
    t3 = (jax.random.uniform(k6, (8, 4, 96, 96)) > 0.5).astype(jnp.float32)
    loss3 = jax.block_until_ready(
        binary_ce_with_dice_loss_forward({"out": x3}, t3))
    ref3 = jax.block_until_ready(_reference(x3, t3))
    assert _close(loss3, ref3), (float(loss3), float(ref3))

    # Test 4: bf16 logits kept bf16 through HBM (dtype-aware granule), f32 targets.
    xb = x.astype(jnp.bfloat16)
    loss4 = jax.block_until_ready(
        binary_ce_with_dice_loss_forward({"out": xb}, targets))
    ref4 = jax.block_until_ready(_reference(xb, targets))
    assert _close(loss4, ref4), (float(loss4), float(ref4))

    print("KERNEL_OK")
</pallas_src>

<mosaic_0001>
module attributes {stable_mosaic.version = 11 : i64} {
  func.func @_loss_kernel(%arg0: i32, %arg1: i32, %arg2: memref<16x128xf32, #tpu.memory_space<vmem>>, %arg3: memref<16x128xf32, #tpu.memory_space<vmem>>, %arg4: memref<1x128xf32, #tpu.memory_space<vmem>>, %arg5: memref<8x128xf32, #tpu.memory_space<vmem>>, %arg6: memref<8x128xf32, #tpu.memory_space<vmem>>, %arg7: memref<8x128xf32, #tpu.memory_space<vmem>>) attributes {dimension_semantics = [#tpu.dimension_semantics<parallel>, #tpu.dimension_semantics<arbitrary>], iteration_bounds = array<i64: 1, 1>, scalar_prefetch = 0 : i64, scratch_operands = 3 : i64, tpu.core_type = #tpu.core_type<tc>, window_params = [{transform_indices = @transform_0, window_bounds = array<i64: 16, 128>}, {transform_indices = @transform_1, window_bounds = array<i64: 16, 128>}, {transform_indices = @transform_2, window_bounds = array<i64: 1, 128>}]} {
    %c0_i32 = arith.constant 0 : i32
    %0 = arith.cmpi eq, %arg1, %c0_i32 : i32
    %1 = arith.extui %0 : i1 to i32
    %c0_i32_0 = arith.constant 0 : i32
    %2 = arith.cmpi ne, %1, %c0_i32_0 : i32
    scf.if %2 {
      %cst_26 = arith.constant 0.000000e+00 : f32
      %47 = vector.broadcast %cst_26 : f32 to vector<8x128xf32>
      %c0_27 = arith.constant 0 : index
      %c0_28 = arith.constant 0 : index
      %48 = vector.load %arg5[%c0_27, %c0_28] : memref<8x128xf32, #tpu.memory_space<vmem>>, vector<8x128xf32>
      tpu.vector_store %arg5[%c0_27, %c0_28], %47 {strides = array<i32>} : memref<8x128xf32, #tpu.memory_space<vmem>>, vector<8x128xf32>,
      %cst_29 = arith.constant 0.000000e+00 : f32
      %49 = vector.broadcast %cst_29 : f32 to vector<8x128xf32>
      %c0_30 = arith.constant 0 : index
      %c0_31 = arith.constant 0 : index
      %50 = vector.load %arg6[%c0_30, %c0_31] : memref<8x128xf32, #tpu.memory_space<vmem>>, vector<8x128xf32>
      tpu.vector_store %arg6[%c0_30, %c0_31], %49 {strides = array<i32>} : memref<8x128xf32, #tpu.memory_space<vmem>>, vector<8x128xf32>,
      %cst_32 = arith.constant 0.000000e+00 : f32
      %51 = vector.broadcast %cst_32 : f32 to vector<8x128xf32>
      %c0_33 = arith.constant 0 : index
      %c0_34 = arith.constant 0 : index
      %52 = vector.load %arg7[%c0_33, %c0_34] : memref<8x128xf32, #tpu.memory_space<vmem>>, vector<8x128xf32>
      tpu.vector_store %arg7[%c0_33, %c0_34], %51 {strides = array<i32>} : memref<8x128xf32, #tpu.memory_space<vmem>>, vector<8x128xf32>,
    } else {
    }
    %c0 = arith.constant 0 : index
    %c0_1 = arith.constant 0 : index
    %3 = vector.load %arg2[%c0, %c0_1] : memref<16x128xf32, #tpu.memory_space<vmem>>, vector<16x128xf32>
    %c0_2 = arith.constant 0 : index
    %c0_3 = arith.constant 0 : index
    %4 = vector.load %arg3[%c0_2, %c0_3] : memref<16x128xf32, #tpu.memory_space<vmem>>, vector<16x128xf32>
    %5 = math.absf %3 : vector<16x128xf32>
    %cst = arith.constant 0.000000e+00 : f32
    %6 = vector.broadcast %cst : f32 to vector<16x128xf32>
    %7 = arith.subf %6, %5 : vector<16x128xf32>
    %8 = math.exp %7 : vector<16x128xf32>
    %cst_4 = arith.constant 1.000000e+00 : f32
    %9 = vector.broadcast %cst_4 : f32 to vector<16x128xf32>
    %10 = arith.addf %9, %8 : vector<16x128xf32>
    %11 = tpu.reciprocal %10 {approx = true} : vector<16x128xf32> -> vector<16x128xf32>
    %12 = arith.mulf %10, %11 : vector<16x128xf32>
    %cst_5 = arith.constant 2.000000e+00 : f32
    %13 = vector.broadcast %cst_5 : f32 to vector<16x128xf32>
    %14 = arith.subf %13, %12 : vector<16x128xf32>
    %15 = arith.mulf %11, %14 : vector<16x128xf32>
    %cst_6 = arith.constant 0.000000e+00 : f32
    %16 = vector.broadcast %cst_6 : f32 to vector<16x128xf32>
    %17 = arith.cmpf oge, %3, %16 : vector<16x128xf32>
    %cst_7 = arith.constant 1.000000e+00 : f32
    %18 = vector.broadcast %cst_7 : f32 to vector<16x128xf32>
    %19 = arith.select %17, %18, %8 : vector<16x128xi1>, vector<16x128xf32>
    %20 = arith.mulf %19, %15 : vector<16x128xf32>
    %cst_8 = arith.constant 0.000000e+00 : f32
    %21 = vector.broadcast %cst_8 : f32 to vector<16x128xf32>
    %22 = arith.maximumf %3, %21 : vector<16x128xf32>
    %23 = arith.mulf %3, %4 : vector<16x128xf32>
    %24 = arith.subf %22, %23 : vector<16x128xf32>
    %25 = math.log1p %8 : vector<16x128xf32>
    %26 = arith.addf %24, %25 : vector<16x128xf32>
    %27 = arith.mulf %20, %4 : vector<16x128xf32>
    %28 = arith.addf %20, %4 : vector<16x128xf32>
    %c0_9 = arith.constant 0 : index
    %c0_10 = arith.constant 0 : index
    %29 = vector.load %arg5[%c0_9, %c0_10] : memref<8x128xf32, #tpu.memory_space<vmem>>, vector<8x128xf32>
    %30 = vector.shape_cast %26 : vector<16x128xf32> to vector<2x8x128xf32>
    %cst_11 = arith.constant dense<0.000000e+00> : vector<8x128xf32>
    %31 = vector.multi_reduction <add>, %30, %cst_11 [0] : vector<2x8x128xf32> to vector<8x128xf32>
    %32 = arith.addf %29, %31 : vector<8x128xf32>
    %c0_12 = arith.constant 0 : index
    %c0_13 = arith.constant 0 : index
    %33 = vector.load %arg5[%c0_12, %c0_13] : memref<8x128xf32, #tpu.memory_space<vmem>>, vector<8x128xf32>
    tpu.vector_store %arg5[%c0_12, %c0_13], %32 {strides = array<i32>} : memref<8x128xf32, #tpu.memory_space<vmem>>, vector<8x128xf32>,
    %c0_14 = arith.constant 0 : index
    %c0_15 = arith.constant 0 : index
    %34 = vector.load %arg6[%c0_14, %c0_15] : memref<8x128xf32, #tpu.memory_space<vmem>>, vector<8x128xf32>
    %35 = vector.shape_cast %27 : vector<16x128xf32> to vector<2x8x128xf32>
    %cst_16 = arith.constant dense<0.000000e+00> : vector<8x128xf32>
    %36 = vector.multi_reduction <add>, %35, %cst_16 [0] : vector<2x8x128xf32> to vector<8x128xf32>
    %37 = arith.addf %34, %36 : vector<8x128xf32>
    %c0_17 = arith.constant 0 : index
    %c0_18 = arith.constant 0 : index
    %38 = vector.load %arg6[%c0_17, %c0_18] : memref<8x128xf32, #tpu.memory_space<vmem>>, vector<8x128xf32>
    tpu.vector_store %arg6[%c0_17, %c0_18], %37 {strides = array<i32>} : memref<8x128xf32, #tpu.memory_space<vmem>>, vector<8x128xf32>,
    %c0_19 = arith.constant 0 : index
    %c0_20 = arith.constant 0 : index
    %39 = vector.load %arg7[%c0_19, %c0_20] : memref<8x128xf32, #tpu.memory_space<vmem>>, vector<8x128xf32>
    %40 = vector.shape_cast %28 : vector<16x128xf32> to vector<2x8x128xf32>
    %cst_21 = arith.constant dense<0.000000e+00> : vector<8x128xf32>
    %41 = vector.multi_reduction <add>, %40, %cst_21 [0] : vector<2x8x128xf32> to vector<8x128xf32>
    %42 = arith.addf %39, %41 : vector<8x128xf32>
    %c0_22 = arith.constant 0 : index
    %c0_23 = arith.constant 0 : index
    %43 = vector.load %arg7[%c0_22, %c0_23] : memref<8x128xf32, #tpu.memory_space<vmem>>, vector<8x128xf32>
    tpu.vector_store %arg7[%c0_22, %c0_23], %42 {strides = array<i32>} : memref<8x128xf32, #tpu.memory_space<vmem>>, vector<8x128xf32>,
    %c0_i32_24 = arith.constant 0 : i32
    %44 = arith.cmpi eq, %arg1, %c0_i32_24 : i32
    %45 = arith.extui %44 : i1 to i32
    %c0_i32_25 = arith.constant 0 : i32
    %46 = arith.cmpi ne, %45, %c0_i32_25 : i32
    scf.if %46 {
      %c0_26 = arith.constant 0 : index
      %c0_27 = arith.constant 0 : index
      %47 = vector.load %arg5[%c0_26, %c0_27] : memref<8x128xf32, #tpu.memory_space<vmem>>, vector<8x128xf32>
      %48 = vector.shape_cast %47 : vector<8x128xf32> to vector<1x8x128xf32>
      %cst_28 = arith.constant dense<0.000000e+00> : vector<1xf32>
      %49 = vector.multi_reduction <add>, %48, %cst_28 [1, 2] : vector<1x8x128xf32> to vector<1xf32>
      %50 = vector.shape_cast %49 : vector<1xf32> to vector<1x1x1xf32>
      %51 = vector.extract %50[0, 0, 0] : f32 from vector<1x1x1xf32>
      %c0_29 = arith.constant 0 : index
      %c0_30 = arith.constant 0 : index
      %52 = vector.load %arg6[%c0_29, %c0_30] : memref<8x128xf32, #tpu.memory_space<vmem>>, vector<8x128xf32>
      %53 = vector.shape_cast %52 : vector<8x128xf32> to vector<1x8x128xf32>
      %cst_31 = arith.constant dense<0.000000e+00> : vector<1xf32>
      %54 = vector.multi_reduction <add>, %53, %cst_31 [1, 2] : vector<1x8x128xf32> to vector<1xf32>
      %55 = vector.shape_cast %54 : vector<1xf32> to vector<1x1x1xf32>
      %56 = vector.extract %55[0, 0, 0] : f32 from vector<1x1x1xf32>
      %c0_32 = arith.constant 0 : index
      %c0_33 = arith.constant 0 : index
      %57 = vector.load %arg7[%c0_32, %c0_33] : memref<8x128xf32, #tpu.memory_space<vmem>>, vector<8x128xf32>
      %58 = vector.shape_cast %57 : vector<8x128xf32> to vector<1x8x128xf32>
      %cst_34 = arith.constant dense<0.000000e+00> : vector<1xf32>
      %59 = vector.multi_reduction <add>, %58, %cst_34 [1, 2] : vector<1x8x128xf32> to vector<1xf32>
      %60 = vector.shape_cast %59 : vector<1xf32> to vector<1x1x1xf32>
      %61 = vector.extract %60[0, 0, 0] : f32 from vector<1x1x1xf32>
      %62 = tpu.iota {dimensions = array<i32: 1>} : vector<1x128xi32>
      %c0_i32_35 = arith.constant 0 : i32
      %63 = vector.broadcast %c0_i32_35 : i32 to vector<1x128xi32>
      %64 = arith.cmpi eq, %62, %63 : vector<1x128xi32>
      %c1_i32 = arith.constant 1 : i32
      %65 = vector.broadcast %c1_i32 : i32 to vector<1x128xi32>
      %66 = arith.cmpi eq, %62, %65 : vector<1x128xi32>
      %c2_i32 = arith.constant 2 : i32
      %67 = vector.broadcast %c2_i32 : i32 to vector<1x128xi32>
      %68 = arith.cmpi eq, %62, %67 : vector<1x128xi32>
      %cst_36 = arith.constant 0.000000e+00 : f32
      %69 = vector.broadcast %61 : f32 to vector<1x128xf32>
      %70 = vector.broadcast %cst_36 : f32 to vector<1x128xf32>
      %71 = arith.select %68, %69, %70 : vector<1x128xi1>, vector<1x128xf32>
      %72 = vector.broadcast %56 : f32 to vector<1x128xf32>
      %73 = arith.select %66, %72, %71 : vector<1x128xi1>, vector<1x128xf32>
      %74 = vector.broadcast %51 : f32 to vector<1x128xf32>
      %75 = arith.select %64, %74, %73 : vector<1x128xi1>, vector<1x128xf32>
      %c0_37 = arith.constant 0 : index
      %c0_38 = arith.constant 0 : index
      %76 = vector.load %arg4[%c0_37, %c0_38] : memref<1x128xf32, #tpu.memory_space<vmem>>, vector<1x128xf32>
      tpu.vector_store %arg4[%c0_37, %c0_38], %75 {strides = array<i32>} : memref<1x128xf32, #tpu.memory_space<vmem>>, vector<1x128xf32>,
    } else {
    }
    return
  }
  func.func @transform_0(%arg0: i32, %arg1: i32) -> (i32, i32) {
    %c1_i32 = arith.constant 1 : i32
    %0 = arith.muli %arg0, %c1_i32 : i32
    %1 = arith.addi %0, %arg1 : i32
    %c0_i32 = arith.constant 0 : i32
    %c0_i32_0 = arith.constant 0 : i32
    return %1, %c0_i32 : i32, i32
  }
  func.func @transform_1(%arg0: i32, %arg1: i32) -> (i32, i32) {
    %c1_i32 = arith.constant 1 : i32
    %0 = arith.muli %arg0, %c1_i32 : i32
    %1 = arith.addi %0, %arg1 : i32
    %c0_i32 = arith.constant 0 : i32
    %c0_i32_0 = arith.constant 0 : i32
    return %1, %c0_i32 : i32, i32
  }
  func.func @transform_2(%arg0: i32, %arg1: i32) -> (i32, i32) {
    %c0_i32 = arith.constant 0 : i32
    %c0_i32_0 = arith.constant 0 : i32
    return %arg0, %c0_i32 : i32, i32
  }
}

</mosaic_0001>

<bundles_post_ra>
// kernel: tpu_custom_call.1
= control target key start
LH: loop header
LB: loop body
LE: loop exit
PB: predicated region body
PF: predicated region fallthrough
CT: control target
= control target key end

     0   :  { %7 = vsyncpa [#allocation6], 0  ;;  %s308_s0 = inlined_call_operand.hbm [shape: f32[16,128], index: 0, kind: input, shape index: {}]   ;;  %s309_s1 = inlined_call_operand.hbm [shape: f32[16,128], index: 1, kind: input, shape index: {}]   ;;  %s310_s2 = inlined_call_operand.hbm [shape: f32[1,128], index: 2, kind: output, shape index: {}]  }
   0x1   :  { %8 = vsyncpa [#allocation9], 0 }
   0x2   :  { %9 = vsyncpa [#allocation7], 0  ;;  %s279_s9 = smov [#allocation5]  }
   0x3   :  { %s19_s10 = sshll.u32 %s279_s9, 4  ;;  %s20_s10 = int_to_ptr.vmem [resolvable:$true] %s19_s10 }
   0x4   :  { %s221_s11 = scalar_lea.vmem %s20_s10, 256  ;;  %p226_p1 = scmp.lt.s32.totalorder %s20_s10, %s20_s10 }
   0x5   :  { %p222_p0 = scmp.ne.s32.totalorder %s20_s10, %s221_s11  ;;  %p227_p2 = scmp.lt.s32.totalorder %s221_s11, %s221_s11 }
   0x7   :  { %p228_p3 = por %p227_p2, %p226_p1 }
   0x9   :  { %p229_p4 = pnand %p228_p3, %p222_p0 }
   0xb   :  { %232 = shalt.err (!%p229_p4)
}
   0xc   :  { %s280_s12 = smov 128   ;;  %s281_s13 = smov 8  }
   0xd   :  { %25 = dma.hbm_to_vmem [thread:$0]  %s308_s0, 256, %s20_s10, [#allocation6], %s280_s12, %s280_s12, %s281_s13  }
   0xe   :  { %s282_s16 = smov [#allocation8]  }
   0xf   :  { %s35_s17 = sshll.u32 %s282_s16, 4  ;;  %s36_s17 = int_to_ptr.vmem [resolvable:$true] %s35_s17 }
  0x10   :  { %s241_s18 = scalar_lea.vmem %s36_s17, 256  ;;  %p246_p6 = scmp.lt.s32.totalorder %s36_s17, %s36_s17 }
  0x11   :  { %p242_p5 = scmp.ne.s32.totalorder %s36_s17, %s241_s18  ;;  %p247_p7 = scmp.lt.s32.totalorder %s241_s18, %s241_s18 }
  0x13   :  { %p248_p8 = por %p247_p7, %p246_p6 }
  0x15   :  { %p249_p9 = pnand %p248_p8, %p242_p5 }
  0x17   :  { %252 = shalt.err (!%p249_p9)
}
  0x18   :  { %41 = dma.hbm_to_vmem [thread:$0]  %s309_s1, 256, %s36_s17, [#allocation9], %s280_s12, %s280_s12, %s281_s13  }
  0x19   :  { %273 = dma.done.wait [#allocation6], 256  }
  0x1a   :  { %274 = vsyncadd [#allocation6], 4294967040 }
  0x1b   :  { %275 = dma.done.wait [#allocation9], 256  }
  0x1c   :  { %276 = vsyncadd [#allocation9], 4294967040  ;;  %v59_v0 = vld [vmem:[#allocation5] sm:$0xff]  ;;  %v60_v1 = vld [vmem:[#allocation5 + $0x8] sm:$0xff]  ;;  %s283_s22 = smov [#allocation10]  }
  0x1d   :  { %v63_v2 = vand.u32 2147483647, %v59_v0  ;;  %v64_v3 = vand.u32 2147483647, %v60_v1  ;;  %v61_v14 = vld [vmem:[#allocation8] sm:$0xff]  ;;  %v62_v15 = vld [vmem:[#allocation8 + $0x8] sm:$0xff] }
  0x1e   :  { %v87_v17 = vmax.f32 %v59_v0, 0.0  ;;  %v89_v18 = vmul.f32 %v61_v14, %v59_v0  ;;  %v88_v21 = vmax.f32 %v60_v1, 0.0  ;;  %v90_v22 = vmul.f32 %v62_v15, %v60_v1  ;;  %s180_s23 = sshll.u32 %s283_s22, 4  ;;  %s181_s23 = int_to_ptr.vmem [resolvable:$true] %s180_s23 }
  0x1f   :  { %v65_v4 = vsub.f32 0.0, %v63_v2  ;;  %v66_v5 = vsub.f32 0.0, %v64_v3  ;;  %vm81_vm2 = vcmp.ge.f32.partialorder %v59_v0, 0.0  ;;  %vm82_vm3 = vcmp.ge.f32.partialorder %v60_v1, 0.0  ;;  %s253_s24 = scalar_lea.vmem %s181_s23, 16  ;;  %s257_s25 = scalar_lea.vmem %s181_s23, 32 }
  0x20   :  { %v91_v26 = vsub.f32 %v87_v17, %v89_v18  ;;  %v92_v29 = vsub.f32 %v88_v21, %v90_v22  ;;  %p254_p10 = scmp.ne.s32.totalorder %s181_s23, %s253_s24  ;;  %p258_p11 = scmp.lt.s32.totalorder %s181_s23, %s181_s23 }
  0x21   :  { %v67_v6 = vmul.f32 1.442695, %v65_v4  ;;  %v69_v7 = vmul.f32 1.442695, %v66_v5  ;;  %p259_p12 = scmp.lt.s32.totalorder %s257_s25, %s253_s24 }
  0x23   :  { %201 = vpow2.f32 %v67_v6  ;;  %p260_p13 = por %p259_p12, %p258_p11 }
  0x24   :  { %203 = vpow2.f32 %v69_v7 }
  0x25   :  { %p261_p0 = pnand %p260_p13, %p254_p10 }
  0x30   :  { %v202_v8 = vpop.eup %201 }
  0x31   :  { %v204_v9 = vpop.eup %203  ;;  %v71_v10 = vadd.f32 1.0, %v202_v8  ;;  %v96_v12 = vmul.f32 -0.5, %v202_v8  ;;  %v99_v19 = vand.u32 2147483647, %v202_v8  ;;  %v83_v42 = vsel %vm81_vm2, 1.0, %v202_v8 }
  0x32   :  { %v72_v11 = vadd.f32 1.0, %v204_v9  ;;  %v105_v13 = vmul.f32 -0.5, %v204_v9  ;;  %v108_v23 = vand.u32 2147483647, %v204_v9  ;;  %v84_v45 = vsel %vm82_vm3, 1.0, %v204_v9 }
  0x33   :  { %205 = vlog2.f32 %v71_v10  ;;  %v97_v16 = vadd.f32 1.0, %v96_v12  ;;  %vm100_vm0 = vcmp.lt.f32.partialorder %v99_v19, 0.0004427343  ;;  %v162_v12 = vlaneseq }
  0x34   :  { %207 = vlog2.f32 %v72_v11  ;;  %v106_v20 = vadd.f32 1.0, %v105_v13  ;;  %vm109_vm1 = vcmp.lt.f32.partialorder %v108_v23, 0.0004427343 }
  0x35   :  { %209 = vrcp.f32 %v71_v10  ;;  %v98_v24 = vmul.f32 %v202_v8, %v97_v16  ;;  %v163_v13 = vand.u32 127, %v162_v12 }
  0x36   :  { %211 = vrcp.f32 %v72_v11  ;;  %v107_v27 = vmul.f32 %v204_v9, %v106_v20 }
  0x37   :  { %vm166_vm4 = vcmp.eq.s32.totalorder %v163_v13, 2  ;;  %vm165_vm5 = vcmp.eq.s32.totalorder %v163_v13, 1  ;;  %vm164_vm6 = vcmp.eq.s32.totalorder %v163_v13, 0 }
  0x40   :  { %v206_v25 = vpop.eup %205 }
  0x41   :  { %v208_v28 = vpop.eup %207  ;;  %v95_v30 = vmul.f32 0.6931472, %v206_v25 }
  0x42   :  { %v210_v31 = vpop.eup %209  ;;  %v104_v32 = vmul.f32 0.6931472, %v208_v28 }
  0x43   :  { %v212_v33 = vpop.eup %211  ;;  %v101_v34 = vsel %vm100_vm0, %v98_v24, %v95_v30  ;;  %v75_v35 = vmul.f32 %v210_v31, %v71_v10 }
  0x44   :  { %v110_v36 = vsel %vm109_vm1, %v107_v27, %v104_v32  ;;  %v111_v37 = vadd.f32 %v101_v34, %v91_v26  ;;  %v76_v38 = vmul.f32 %v212_v33, %v72_v11 }
  0x45   :  { %v112_v39 = vadd.f32 %v110_v36, %v92_v29  ;;  %v77_v40 = vsub.f32 2.0, %v75_v35 }
  0x46   :  { %v78_v41 = vsub.f32 2.0, %v76_v38 }
  0x47   :  { %v118_v43 = vadd.f32 %v112_v39, %v111_v37  ;;  %v79_v44 = vmul.f32 %v210_v31, %v77_v40 }
  0x48   :  { %v80_v46 = vmul.f32 %v212_v33, %v78_v41 }
  0x49   :  { %133 = vadd.xlane.f32.xlu0 %v118_v43  ;;  %v85_v47 = vmul.f32 %v83_v42, %v79_v44 }
  0x4a   :  { %v86_v48 = vmul.f32 %v84_v45, %v80_v46 }
  0x4b   :  { %v115_v49 = vadd.f32 %v85_v47, %v61_v14  ;;  %v113_v50 = vmul.f32 %v85_v47, %v61_v14 }
  0x4c   :  { %v116_v51 = vadd.f32 %v86_v48, %v62_v15  ;;  %v114_v52 = vmul.f32 %v86_v48, %v62_v15 }
  0x4e   :  { %v126_v53 = vadd.f32 %v116_v51, %v115_v49  ;;  %v122_v54 = vadd.f32 %v114_v52, %v113_v50 }
  0x50   :  { %153 = vadd.xlane.f32.xlu1 %v126_v53  ;;  %143 = vadd.xlane.f32.xlu0 %v122_v54 }
  0xd2   :  { %v134_v55 = vpop.xlane.xlu0 %133 }
  0xd3   :  { %v135_v56 = vrot.slane %v134_v55, 4 }
  0xd5   :  { %v136_v57 = vadd.f32 %v135_v56, %v134_v55 }
  0xd7   :  { %v137_v58 = vrot.slane %v136_v57, 2 }
  0xd9   :  { %v154_v59 = vpop.xlane.xlu1 %153  ;;  %v144_v60 = vpop.xlane.xlu0 %143  ;;  %v138_v61 = vadd.f32 %v137_v58, %v136_v57 }
  0xda   :  { %v155_v62 = vrot.slane %v154_v59, 4  ;;  %v145_v63 = vrot.slane %v144_v60, 4 }
  0xdb   :  { %v139_v0 = vrot.slane %v138_v61, 1 }
  0xdc   :  { %v156_v1 = vadd.f32 %v155_v62, %v154_v59  ;;  %v146_v2 = vadd.f32 %v145_v63, %v144_v60 }
  0xdd   :  { %v140_v3 = vadd.f32 %v139_v0, %v138_v61 }
  0xde   :  { %v157_v4 = vrot.slane %v156_v1, 2  ;;  %v147_v5 = vrot.slane %v146_v2, 2 }
  0xdf   :  { %190 = vpush %v140_v3 }
  0xe0   :  { %v158_v6 = vadd.f32 %v157_v4, %v156_v1  ;;  %v148_v7 = vadd.f32 %v147_v5, %v146_v2 }
  0xe2   :  { %v149_v8 = vrot.slane %v148_v7, 1  ;;  %v159_v9 = vrot.slane %v158_v6, 1 }
  0xe4   :  { %v150_v10 = vadd.f32 %v149_v8, %v148_v7  ;;  %v160_v11 = vadd.f32 %v159_v9, %v158_v6 }
  0xe6   :  { %192 = vpush %v150_v10 }
  0xe7   :  { %194 = vpush %v160_v11 }
 0x110   :  { %s191_s0 = spop %190 }
 0x111   :  { %v171_v17 = vstv %s191_s0 }
 0x117   :  { %s193_s1 = spop %192 }
 0x118   :  { %v169_v14 = vstv %s193_s1  ;;  %s195_s21 = spop %194 }
 0x119   :  { %v167_v15 = vstv %s195_s21 }
 0x11a   :  { %v168_v16 = vsel %vm166_vm4, %v167_v15, 0.0 }
 0x11b   :  { %v170_v18 = vsel %vm165_vm5, %v169_v14, %v168_v16 }
 0x11c   :  { %v172_v19 = vsel %vm164_vm6, %v171_v17, %v170_v18 }
 0x11d   :  { %173 = vst [vmem:[#allocation10] sm:$0x1] %v172_v19 }
 0x11e   :  { %264 = shalt.err (!%p261_p0)
}
 0x11f   :  { %183 = dma.vmem_to_hbm [thread:$0]  %s181_s23, 16, %s310_s2, [#allocation7]  }
 0x120   :  { %277 = dma.done.wait [#allocation7], 16  }
 0x121   :  { %278 = vsyncadd [#allocation7], 4294967280 }
 0x122   :  { %187 = vsyncpa [#allocation6], 1 }
 0x123   :  { %188 = vsyncpa [#allocation9], 1 }
 0x124   :  { %189 = vsyncpa [#allocation7], 1 }

</bundles_post_ra>
